<compile_context>
chip_gen: v6e
topology: v6e:2x2x1
jax: 0.10.0
libtpu: 0.0.40
codegen_flags: <defaults>
</compile_context>

<pallas_src>
import math
from functools import partial

import jax
import jax.numpy as jnp
from jax.experimental import pallas as pl
from jax.experimental.pallas import tpu as pltpu


def _layernorm(v, eps=1e-6):
    # LayerNorm without affine params (elementwise_affine=False), biased var.
    mu = jnp.mean(v, axis=-1, keepdims=True)
    var = jnp.mean(jnp.square(v - mu), axis=-1, keepdims=True)
    return (v - mu) * jax.lax.rsqrt(var + eps)


def _gelu_tanh(v):
    c = math.sqrt(2.0 / math.pi)
    return 0.5 * v * (1.0 + jnp.tanh(c * (v + 0.044715 * v * v * v)))


def sit_block_kernel(xt_ref, xf_ref, mods_ref,
                     w_q_ref, b_q_ref,
                     w_kv_ref, b_kv_ref,
                     w_proj_ref, b_proj_ref,
                     w_fc1_ref, b_fc1_ref,
                     w_fc2_ref, b_fc2_ref,
                     o_ref,
                     k_scr, v_scr, *, num_heads):
    f32 = jnp.float32
    bf16 = jnp.bfloat16

    x_tile = xt_ref[...]           # (TN, D) query tokens + residual
    mods = mods_ref[...]           # (6, D) adaLN vectors (precomputed outside)
    TN, D = x_tile.shape
    H = num_heads
    HD = D // H

    # adaLN rows — keep (1, D) shape so broadcasts are hoisted & done once.
    shift_msa = mods[0:1, :]
    scale_msa = 1.0 + mods[1:2, :]
    gate_msa = mods[2:3, :]
    shift_mlp = mods[3:4, :]
    scale_mlp = 1.0 + mods[4:5, :]
    gate_mlp = mods[5:6, :]

    # ---------------- K/V: once per batch element ----------------
    # t == 0 projects the whole sequence to K/V, splits heads and caches the
    # bf16 result in VMEM scratch; subsequent query tiles just reload it.
    @pl.when(pl.program_id(1) == 0)
    def _():
        x_full = xf_ref[...]                                            # (N, D)
        mod_kv = (_layernorm(x_full) * scale_msa + shift_msa).astype(bf16)
        kv = jnp.dot(mod_kv, w_kv_ref[...],
                     preferred_element_type=f32) + b_kv_ref[...]        # (N, 2D)
        for h in range(H):
            k_scr[h] = kv[:, h * HD:(h + 1) * HD].astype(bf16)
            v_scr[h] = kv[:, D + h * HD:D + (h + 1) * HD].astype(bf16)

    # ---------------- attention branch (per query tile) ----------------
    mod_q = (_layernorm(x_tile) * scale_msa + shift_msa).astype(bf16)   # (TN, D)
    q = jnp.dot(mod_q, w_q_ref[...],
                preferred_element_type=f32) + b_q_ref[...]              # (TN, D)

    # Head-major query (H, TN, HD); K/V already head-major in scratch.
    q_h = jnp.stack([q[:, h * HD:(h + 1) * HD] for h in range(H)], axis=0)
    k_h = k_scr[...]                                                    # (H, N, HD) bf16
    v_h = v_scr[...]                                                    # (H, N, HD) bf16

    scale = 1.0 / math.sqrt(HD)
    s = jnp.einsum('hqd,hkd->hqk', q_h.astype(bf16), k_h,
                   preferred_element_type=f32) * scale                  # (H, TN, N)
    s = s - jnp.max(s, axis=-1, keepdims=True)
    p = jnp.exp(s)
    p = p * pl.reciprocal(jnp.sum(p, axis=-1, keepdims=True), approx=True)
    o_h = jnp.einsum('hqk,hkd->hqd', p.astype(bf16), v_h,
                     preferred_element_type=f32)                        # (H, TN, HD)

    # Concat heads back to (TN, D) and do ONE full-K output projection.
    attn = jnp.concatenate([o_h[h] for h in range(H)], axis=-1)         # (TN, D)
    attn = jnp.dot(attn.astype(bf16), w_proj_ref[...],
                   preferred_element_type=f32) + b_proj_ref[...]
    x1 = x_tile + gate_msa * attn                                       # (TN, D) f32

    # ---------------- MLP branch ----------------
    mod2 = (_layernorm(x1) * scale_mlp + shift_mlp).astype(bf16)
    h1 = jnp.dot(mod2, w_fc1_ref[...],
                 preferred_element_type=f32) + b_fc1_ref[...]           # (TN, M)
    h1 = _gelu_tanh(h1)
    mlp = jnp.dot(h1.astype(bf16), w_fc2_ref[...],
                  preferred_element_type=f32) + b_fc2_ref[...]          # (TN, D)

    o_ref[...] = (x1 + gate_mlp * mlp).astype(o_ref.dtype)


def sit_block(x, c, params, *, num_heads, token_tile=None):
    B, N, D = x.shape
    M = params["w_fc1"].shape[1]
    H, HD = num_heads, D // num_heads
    f32 = jnp.float32
    bf16 = jnp.bfloat16

    # adaLN modulation hoisted out of the kernel: a (B, D) @ (D, 6D) matmul is
    # tiny for the MXU and its weight is the single largest tensor — keeping
    # it out frees the most VMEM of any change.
    ada = jax.nn.silu(c.astype(f32)) @ params["w_ada"] + params["b_ada"][0]
    mods = ada.reshape(B, 6, D)

    # Split fused QKV so Q is computed only for the query tile while K/V are
    # computed once per batch element for the full sequence.
    w_qkv, b_qkv = params["w_qkv"], params["b_qkv"]
    w_q, w_kv = w_qkv[:, :D].astype(bf16), w_qkv[:, D:].astype(bf16)
    b_q, b_kv = b_qkv[:, :D], b_qkv[:, D:]

    # bf16 weights: MXU-native throughput, half the HBM/VMEM footprint.
    w_proj = params["w_proj"].astype(bf16)
    w_fc1 = params["w_fc1"].astype(bf16)
    w_fc2 = params["w_fc2"].astype(bf16)

    if token_tile is None:
        token_tile = N if N <= 256 else 256
    if N % token_tile != 0:
        token_tile = N
    TN = token_tile
    T = N // TN

    def wspec(shape):
        return pl.BlockSpec(shape, lambda b, t: (0,) * len(shape))

    kernel = partial(sit_block_kernel, num_heads=num_heads)
    return pl.pallas_call(
        kernel,
        out_shape=jax.ShapeDtypeStruct((B, N, D), x.dtype),
        grid=(B, T),
        in_specs=[
            pl.BlockSpec((None, TN, D), lambda b, t: (b, t, 0)),  # x query tile
            pl.BlockSpec((None, N, D), lambda b, t: (b, 0, 0)),   # x full (K/V)
            pl.BlockSpec((None, 6, D), lambda b, t: (b, 0, 0)),   # adaLN vectors
            wspec((D, D)), wspec((1, D)),                         # w_q, b_q
            wspec((D, 2 * D)), wspec((1, 2 * D)),                 # w_kv, b_kv
            wspec((D, D)), wspec((1, D)),                         # attn proj
            wspec((D, M)), wspec((1, M)),                         # mlp fc1
            wspec((M, D)), wspec((1, D)),                         # mlp fc2
        ],
        out_specs=pl.BlockSpec((None, TN, D), lambda b, t: (b, t, 0)),
        scratch_shapes=[
            pltpu.VMEM((H, N, HD), bf16),   # cached K (head-major)
            pltpu.VMEM((H, N, HD), bf16),   # cached V (head-major)
        ],
        compiler_params=pltpu.CompilerParams(
            # batch axis shards across cores; token axis is sequential so the
            # K/V scratch computed at t == 0 is valid for all later tiles.
            dimension_semantics=("parallel", "arbitrary"),
            vmem_limit_bytes=64 * 1024 * 1024),
    )(x, x, mods,
      w_q, b_q, w_kv, b_kv,
      w_proj, params["b_proj"],
      w_fc1, params["b_fc1"],
      w_fc2, params["b_fc2"])


def sit_block_ref(x, c, p, *, num_heads):
    """Pure-JAX f32 reference matching the PyTorch forward."""
    B, N, D = x.shape
    H, HD = num_heads, D // num_heads

    def ln(v):
        mu = v.mean(-1, keepdims=True)
        var = ((v - mu) ** 2).mean(-1, keepdims=True)
        return (v - mu) / jnp.sqrt(var + 1e-6)

    ada = jax.nn.silu(c) @ p["w_ada"] + p["b_ada"][0]
    sm, cm, gm, sp, cp, gp = jnp.split(ada, 6, axis=-1)

    mod1 = ln(x) * (1 + cm[:, None, :]) + sm[:, None, :]
    qkv = mod1 @ p["w_qkv"] + p["b_qkv"][0]
    qkv = qkv.reshape(B, N, 3, H, HD).transpose(2, 0, 3, 1, 4)
    q, k, v = qkv[0], qkv[1], qkv[2]
    s = jnp.einsum("bhqd,bhkd->bhqk", q, k) / math.sqrt(HD)
    a = jax.nn.softmax(s, axis=-1)
    o = jnp.einsum("bhqk,bhkd->bhqd", a, v).transpose(0, 2, 1, 3).reshape(B, N, D)
    o = o @ p["w_proj"] + p["b_proj"][0]
    x1 = x + gm[:, None, :] * o

    mod2 = ln(x1) * (1 + cp[:, None, :]) + sp[:, None, :]
    h = mod2 @ p["w_fc1"] + p["b_fc1"][0]
    h = 0.5 * h * (1 + jnp.tanh(math.sqrt(2 / math.pi) * (h + 0.044715 * h ** 3)))
    mlp = h @ p["w_fc2"] + p["b_fc2"][0]
    return x1 + gp[:, None, :] * mlp


if __name__ == "__main__":
    B, N, D = 2, 8, 32          # batch, tokens, hidden_size
    H = 4                        # num_heads
    M = int(D * 4.0)             # mlp_hidden_dim

    key = jax.random.PRNGKey(0)
    ks = jax.random.split(key, 14)
    f32 = jnp.float32
    params = {
        "w_ada":  0.05 * jax.random.normal(ks[0], (D, 6 * D), f32),
        "b_ada":  0.02 * jax.random.normal(ks[1], (1, 6 * D), f32),
        "w_qkv":  0.05 * jax.random.normal(ks[2], (D, 3 * D), f32),
        "b_qkv":  0.02 * jax.random.normal(ks[3], (1, 3 * D), f32),
        "w_proj": 0.05 * jax.random.normal(ks[4], (D, D), f32),
        "b_proj": 0.02 * jax.random.normal(ks[5], (1, D), f32),
        "w_fc1":  0.05 * jax.random.normal(ks[6], (D, M), f32),
        "b_fc1":  0.02 * jax.random.normal(ks[7], (1, M), f32),
        "w_fc2":  0.05 * jax.random.normal(ks[8], (M, D), f32),
        "b_fc2":  0.02 * jax.random.normal(ks[9], (1, D), f32),
    }
    x = jax.random.normal(ks[10], (B, N, D), f32)
    c = jax.random.normal(ks[11], (B, D), f32)

    out = sit_block(x, c, params, num_heads=H)
    out = jax.block_until_ready(out)

    ref = sit_block_ref(x, c, params, num_heads=H)
    assert out.shape == (B, N, D) and out.dtype == jnp.float32
    # bf16 matmul operands (f32 accumulation) => slightly looser tolerance.
    assert jnp.allclose(out, ref, atol=2e-2, rtol=2e-2), (
        float(jnp.max(jnp.abs(out - ref))))
    print("KERNEL_OK")
</pallas_src>

<mosaic_0001>
module attributes {stable_mosaic.version = 11 : i64} {
  func.func @sit_block_kernel(%arg0: i32, %arg1: i32, %arg2: memref<1x8x32xf32, #tpu.memory_space<vmem>>, %arg3: memref<1x8x32xf32, #tpu.memory_space<vmem>>, %arg4: memref<1x6x32xf32, #tpu.memory_space<vmem>>, %arg5: memref<32x32xbf16, #tpu.memory_space<vmem>>, %arg6: memref<1x32xf32, #tpu.memory_space<vmem>>, %arg7: memref<32x64xbf16, #tpu.memory_space<vmem>>, %arg8: memref<1x64xf32, #tpu.memory_space<vmem>>, %arg9: memref<32x32xbf16, #tpu.memory_space<vmem>>, %arg10: memref<1x32xf32, #tpu.memory_space<vmem>>, %arg11: memref<32x128xbf16, #tpu.memory_space<vmem>>, %arg12: memref<1x128xf32, #tpu.memory_space<vmem>>, %arg13: memref<128x32xbf16, #tpu.memory_space<vmem>>, %arg14: memref<1x32xf32, #tpu.memory_space<vmem>>, %arg15: memref<1x8x32xf32, #tpu.memory_space<vmem>>, %arg16: memref<4x8x8xbf16, #tpu.memory_space<vmem>>, %arg17: memref<4x8x8xbf16, #tpu.memory_space<vmem>>) attributes {dimension_semantics = [#tpu.dimension_semantics<parallel>, #tpu.dimension_semantics<arbitrary>], iteration_bounds = array<i64: 2, 1>, scalar_prefetch = 0 : i64, scratch_operands = 2 : i64, tpu.core_type = #tpu.core_type<tc>, window_params = [{transform_indices = @transform_0, window_bounds = array<i64: 1, 8, 32>}, {transform_indices = @transform_1, window_bounds = array<i64: 1, 8, 32>}, {transform_indices = @transform_2, window_bounds = array<i64: 1, 6, 32>}, {pipeline_mode = #tpu.pipeline_mode<synchronous>, transform_indices = @transform_3, window_bounds = array<i64: 32, 32>}, {pipeline_mode = #tpu.pipeline_mode<synchronous>, transform_indices = @transform_4, window_bounds = array<i64: 1, 32>}, {pipeline_mode = #tpu.pipeline_mode<synchronous>, transform_indices = @transform_5, window_bounds = array<i64: 32, 64>}, {pipeline_mode = #tpu.pipeline_mode<synchronous>, transform_indices = @transform_6, window_bounds = array<i64: 1, 64>}, {pipeline_mode = #tpu.pipeline_mode<synchronous>, transform_indices = @transform_7, window_bounds = array<i64: 32, 32>}, {pipeline_mode = #tpu.pipeline_mode<synchronous>, transform_indices = @transform_8, window_bounds = array<i64: 1, 32>}, {pipeline_mode = #tpu.pipeline_mode<synchronous>, transform_indices = @transform_9, window_bounds = array<i64: 32, 128>}, {pipeline_mode = #tpu.pipeline_mode<synchronous>, transform_indices = @transform_10, window_bounds = array<i64: 1, 128>}, {pipeline_mode = #tpu.pipeline_mode<synchronous>, transform_indices = @transform_11, window_bounds = array<i64: 128, 32>}, {pipeline_mode = #tpu.pipeline_mode<synchronous>, transform_indices = @transform_12, window_bounds = array<i64: 1, 32>}, {transform_indices = @transform_13, window_bounds = array<i64: 1, 8, 32>}]} {
    %c0 = arith.constant 0 : index
    %c0_0 = arith.constant 0 : index
    %c0_1 = arith.constant 0 : index
    %0 = vector.load %arg2[%c0, %c0_0, %c0_1] : memref<1x8x32xf32, #tpu.memory_space<vmem>>, vector<1x8x32xf32>
    %1 = vector.shape_cast %0 : vector<1x8x32xf32> to vector<8x32xf32>
    %c0_2 = arith.constant 0 : index
    %c0_3 = arith.constant 0 : index
    %c0_4 = arith.constant 0 : index
    %2 = vector.load %arg4[%c0_2, %c0_3, %c0_4] : memref<1x6x32xf32, #tpu.memory_space<vmem>>, vector<1x6x32xf32>
    %3 = vector.shape_cast %2 : vector<1x6x32xf32> to vector<6x32xf32>
    %4 = vector.extract_strided_slice %3 {offsets = [0, 0], sizes = [1, 32], strides = [1, 1]} : vector<6x32xf32> to vector<1x32xf32>
    %5 = vector.extract_strided_slice %3 {offsets = [1, 0], sizes = [1, 32], strides = [1, 1]} : vector<6x32xf32> to vector<1x32xf32>
    %cst = arith.constant 1.000000e+00 : f32
    %6 = vector.broadcast %cst : f32 to vector<1x32xf32>
    %7 = arith.addf %6, %5 : vector<1x32xf32>
    %8 = vector.extract_strided_slice %3 {offsets = [2, 0], sizes = [1, 32], strides = [1, 1]} : vector<6x32xf32> to vector<1x32xf32>
    %9 = vector.extract_strided_slice %3 {offsets = [3, 0], sizes = [1, 32], strides = [1, 1]} : vector<6x32xf32> to vector<1x32xf32>
    %10 = vector.extract_strided_slice %3 {offsets = [4, 0], sizes = [1, 32], strides = [1, 1]} : vector<6x32xf32> to vector<1x32xf32>
    %cst_5 = arith.constant 1.000000e+00 : f32
    %11 = vector.broadcast %cst_5 : f32 to vector<1x32xf32>
    %12 = arith.addf %11, %10 : vector<1x32xf32>
    %13 = vector.extract_strided_slice %3 {offsets = [5, 0], sizes = [1, 32], strides = [1, 1]} : vector<6x32xf32> to vector<1x32xf32>
    %c0_i32 = arith.constant 0 : i32
    %14 = arith.cmpi eq, %arg1, %c0_i32 : i32
    %15 = arith.extui %14 : i1 to i32
    %c0_i32_6 = arith.constant 0 : i32
    %16 = arith.cmpi ne, %15, %c0_i32_6 : i32
    scf.if %16 {
      %c0_55 = arith.constant 0 : index
      %c0_56 = arith.constant 0 : index
      %c0_57 = arith.constant 0 : index
      %143 = vector.load %arg3[%c0_55, %c0_56, %c0_57] : memref<1x8x32xf32, #tpu.memory_space<vmem>>, vector<1x8x32xf32>
      %144 = vector.shape_cast %143 : vector<1x8x32xf32> to vector<8x32xf32>
      %cst_58 = arith.constant dense<0.000000e+00> : vector<8xf32>
      %145 = vector.multi_reduction <add>, %144, %cst_58 [1] : vector<8x32xf32> to vector<8xf32>
      %146 = vector.shape_cast %145 : vector<8xf32> to vector<8x1xf32>
      %cst_59 = arith.constant 3.200000e+01 : f32
      %147 = vector.broadcast %cst_59 : f32 to vector<8x1xf32>
      %148 = arith.divf %146, %147 : vector<8x1xf32>
      %149 = vector.broadcast %148 : vector<8x1xf32> to vector<8x32xf32>
      %150 = arith.subf %144, %149 : vector<8x32xf32>
      %151 = arith.mulf %150, %150 : vector<8x32xf32>
      %cst_60 = arith.constant dense<0.000000e+00> : vector<8xf32>
      %152 = vector.multi_reduction <add>, %151, %cst_60 [1] : vector<8x32xf32> to vector<8xf32>
      %153 = vector.shape_cast %152 : vector<8xf32> to vector<8x1xf32>
      %cst_61 = arith.constant 3.200000e+01 : f32
      %154 = vector.broadcast %cst_61 : f32 to vector<8x1xf32>
      %155 = arith.divf %153, %154 : vector<8x1xf32>
      %156 = vector.broadcast %148 : vector<8x1xf32> to vector<8x32xf32>
      %157 = arith.subf %144, %156 : vector<8x32xf32>
      %cst_62 = arith.constant 9.99999997E-7 : f32
      %158 = vector.broadcast %cst_62 : f32 to vector<8x1xf32>
      %159 = arith.addf %155, %158 : vector<8x1xf32>
      %160 = math.rsqrt %159 : vector<8x1xf32>
      %161 = vector.broadcast %160 : vector<8x1xf32> to vector<8x32xf32>
      %162 = arith.mulf %157, %161 : vector<8x32xf32>
      %163 = vector.broadcast %7 : vector<1x32xf32> to vector<8x32xf32>
      %164 = arith.mulf %162, %163 : vector<8x32xf32>
      %165 = vector.broadcast %4 : vector<1x32xf32> to vector<8x32xf32>
      %166 = arith.addf %164, %165 : vector<8x32xf32>
      %167 = arith.truncf %166 : vector<8x32xf32> to vector<8x32xbf16>
      %c0_63 = arith.constant 0 : index
      %c0_64 = arith.constant 0 : index
      %168 = vector.load %arg7[%c0_63, %c0_64] : memref<32x64xbf16, #tpu.memory_space<vmem>>, vector<32x64xbf16>
      %cst_65 = arith.constant dense<0.000000e+00> : vector<8x64xf32>
      %169 = tpu.matmul %167, %168, %cst_65 {dimension_numbers = #tpu.dot_dimension_numbers<[1], [0], [0], [1], [0, 0, 1, 1], [], []>} : vector<8x32xbf16>, vector<32x64xbf16>, vector<8x64xf32> -> vector<8x64xf32>
      %c0_66 = arith.constant 0 : index
      %c0_67 = arith.constant 0 : index
      %170 = vector.load %arg8[%c0_66, %c0_67] : memref<1x64xf32, #tpu.memory_space<vmem>>, vector<1x64xf32>
      %171 = vector.broadcast %170 : vector<1x64xf32> to vector<8x64xf32>
      %172 = arith.addf %169, %171 : vector<8x64xf32>
      %173 = vector.extract_strided_slice %172 {offsets = [0, 0], sizes = [8, 8], strides = [1, 1]} : vector<8x64xf32> to vector<8x8xf32>
      %174 = arith.truncf %173 : vector<8x8xf32> to vector<8x8xbf16>
      %c0_68 = arith.constant 0 : index
      %c0_69 = arith.constant 0 : index
      %c0_70 = arith.constant 0 : index
      %175 = vector.load %arg16[%c0_68, %c0_69, %c0_70] : memref<4x8x8xbf16, #tpu.memory_space<vmem>>, vector<1x8x8xbf16>
      %176 = vector.shape_cast %175 : vector<1x8x8xbf16> to vector<8x8xbf16>
      %177 = vector.shape_cast %174 : vector<8x8xbf16> to vector<1x8x8xbf16>
      tpu.vector_store %arg16[%c0_68, %c0_69, %c0_70], %177 {strides = array<i32>} : memref<4x8x8xbf16, #tpu.memory_space<vmem>>, vector<1x8x8xbf16>,
      %178 = vector.extract_strided_slice %172 {offsets = [0, 32], sizes = [8, 8], strides = [1, 1]} : vector<8x64xf32> to vector<8x8xf32>
      %179 = arith.truncf %178 : vector<8x8xf32> to vector<8x8xbf16>
      %c0_71 = arith.constant 0 : index
      %c0_72 = arith.constant 0 : index
      %c0_73 = arith.constant 0 : index
      %180 = vector.load %arg17[%c0_71, %c0_72, %c0_73] : memref<4x8x8xbf16, #tpu.memory_space<vmem>>, vector<1x8x8xbf16>
      %181 = vector.shape_cast %180 : vector<1x8x8xbf16> to vector<8x8xbf16>
      %182 = vector.shape_cast %179 : vector<8x8xbf16> to vector<1x8x8xbf16>
      tpu.vector_store %arg17[%c0_71, %c0_72, %c0_73], %182 {strides = array<i32>} : memref<4x8x8xbf16, #tpu.memory_space<vmem>>, vector<1x8x8xbf16>,
      %183 = vector.extract_strided_slice %172 {offsets = [0, 8], sizes = [8, 8], strides = [1, 1]} : vector<8x64xf32> to vector<8x8xf32>
      %184 = arith.truncf %183 : vector<8x8xf32> to vector<8x8xbf16>
      %c1 = arith.constant 1 : index
      %c0_74 = arith.constant 0 : index
      %c0_75 = arith.constant 0 : index
      %185 = vector.load %arg16[%c1, %c0_74, %c0_75] : memref<4x8x8xbf16, #tpu.memory_space<vmem>>, vector<1x8x8xbf16>
      %186 = vector.shape_cast %185 : vector<1x8x8xbf16> to vector<8x8xbf16>
      %187 = vector.shape_cast %184 : vector<8x8xbf16> to vector<1x8x8xbf16>
      tpu.vector_store %arg16[%c1, %c0_74, %c0_75], %187 {strides = array<i32>} : memref<4x8x8xbf16, #tpu.memory_space<vmem>>, vector<1x8x8xbf16>,
      %188 = vector.extract_strided_slice %172 {offsets = [0, 40], sizes = [8, 8], strides = [1, 1]} : vector<8x64xf32> to vector<8x8xf32>
      %189 = arith.truncf %188 : vector<8x8xf32> to vector<8x8xbf16>
      %c1_76 = arith.constant 1 : index
      %c0_77 = arith.constant 0 : index
      %c0_78 = arith.constant 0 : index
      %190 = vector.load %arg17[%c1_76, %c0_77, %c0_78] : memref<4x8x8xbf16, #tpu.memory_space<vmem>>, vector<1x8x8xbf16>
      %191 = vector.shape_cast %190 : vector<1x8x8xbf16> to vector<8x8xbf16>
      %192 = vector.shape_cast %189 : vector<8x8xbf16> to vector<1x8x8xbf16>
      tpu.vector_store %arg17[%c1_76, %c0_77, %c0_78], %192 {strides = array<i32>} : memref<4x8x8xbf16, #tpu.memory_space<vmem>>, vector<1x8x8xbf16>,
      %193 = vector.extract_strided_slice %172 {offsets = [0, 16], sizes = [8, 8], strides = [1, 1]} : vector<8x64xf32> to vector<8x8xf32>
      %194 = arith.truncf %193 : vector<8x8xf32> to vector<8x8xbf16>
      %c2 = arith.constant 2 : index
      %c0_79 = arith.constant 0 : index
      %c0_80 = arith.constant 0 : index
      %195 = vector.load %arg16[%c2, %c0_79, %c0_80] : memref<4x8x8xbf16, #tpu.memory_space<vmem>>, vector<1x8x8xbf16>
      %196 = vector.shape_cast %195 : vector<1x8x8xbf16> to vector<8x8xbf16>
      %197 = vector.shape_cast %194 : vector<8x8xbf16> to vector<1x8x8xbf16>
      tpu.vector_store %arg16[%c2, %c0_79, %c0_80], %197 {strides = array<i32>} : memref<4x8x8xbf16, #tpu.memory_space<vmem>>, vector<1x8x8xbf16>,
      %198 = vector.extract_strided_slice %172 {offsets = [0, 48], sizes = [8, 8], strides = [1, 1]} : vector<8x64xf32> to vector<8x8xf32>
      %199 = arith.truncf %198 : vector<8x8xf32> to vector<8x8xbf16>
      %c2_81 = arith.constant 2 : index
      %c0_82 = arith.constant 0 : index
      %c0_83 = arith.constant 0 : index
      %200 = vector.load %arg17[%c2_81, %c0_82, %c0_83] : memref<4x8x8xbf16, #tpu.memory_space<vmem>>, vector<1x8x8xbf16>
      %201 = vector.shape_cast %200 : vector<1x8x8xbf16> to vector<8x8xbf16>
      %202 = vector.shape_cast %199 : vector<8x8xbf16> to vector<1x8x8xbf16>
      tpu.vector_store %arg17[%c2_81, %c0_82, %c0_83], %202 {strides = array<i32>} : memref<4x8x8xbf16, #tpu.memory_space<vmem>>, vector<1x8x8xbf16>,
      %203 = vector.extract_strided_slice %172 {offsets = [0, 24], sizes = [8, 8], strides = [1, 1]} : vector<8x64xf32> to vector<8x8xf32>
      %204 = arith.truncf %203 : vector<8x8xf32> to vector<8x8xbf16>
      %c3 = arith.constant 3 : index
      %c0_84 = arith.constant 0 : index
      %c0_85 = arith.constant 0 : index
      %205 = vector.load %arg16[%c3, %c0_84, %c0_85] : memref<4x8x8xbf16, #tpu.memory_space<vmem>>, vector<1x8x8xbf16>
      %206 = vector.shape_cast %205 : vector<1x8x8xbf16> to vector<8x8xbf16>
      %207 = vector.shape_cast %204 : vector<8x8xbf16> to vector<1x8x8xbf16>
      tpu.vector_store %arg16[%c3, %c0_84, %c0_85], %207 {strides = array<i32>} : memref<4x8x8xbf16, #tpu.memory_space<vmem>>, vector<1x8x8xbf16>,
      %208 = vector.extract_strided_slice %172 {offsets = [0, 56], sizes = [8, 8], strides = [1, 1]} : vector<8x64xf32> to vector<8x8xf32>
      %209 = arith.truncf %208 : vector<8x8xf32> to vector<8x8xbf16>
      %c3_86 = arith.constant 3 : index
      %c0_87 = arith.constant 0 : index
      %c0_88 = arith.constant 0 : index
      %210 = vector.load %arg17[%c3_86, %c0_87, %c0_88] : memref<4x8x8xbf16, #tpu.memory_space<vmem>>, vector<1x8x8xbf16>
      %211 = vector.shape_cast %210 : vector<1x8x8xbf16> to vector<8x8xbf16>
      %212 = vector.shape_cast %209 : vector<8x8xbf16> to vector<1x8x8xbf16>
      tpu.vector_store %arg17[%c3_86, %c0_87, %c0_88], %212 {strides = array<i32>} : memref<4x8x8xbf16, #tpu.memory_space<vmem>>, vector<1x8x8xbf16>,
    } else {
    }
    %cst_7 = arith.constant dense<0.000000e+00> : vector<8xf32>
    %17 = vector.multi_reduction <add>, %1, %cst_7 [1] : vector<8x32xf32> to vector<8xf32>
    %18 = vector.shape_cast %17 : vector<8xf32> to vector<8x1xf32>
    %cst_8 = arith.constant 3.200000e+01 : f32
    %19 = vector.broadcast %cst_8 : f32 to vector<8x1xf32>
    %20 = arith.divf %18, %19 : vector<8x1xf32>
    %21 = vector.broadcast %20 : vector<8x1xf32> to vector<8x32xf32>
    %22 = arith.subf %1, %21 : vector<8x32xf32>
    %23 = arith.mulf %22, %22 : vector<8x32xf32>
    %cst_9 = arith.constant dense<0.000000e+00> : vector<8xf32>
    %24 = vector.multi_reduction <add>, %23, %cst_9 [1] : vector<8x32xf32> to vector<8xf32>
    %25 = vector.shape_cast %24 : vector<8xf32> to vector<8x1xf32>
    %cst_10 = arith.constant 3.200000e+01 : f32
    %26 = vector.broadcast %cst_10 : f32 to vector<8x1xf32>
    %27 = arith.divf %25, %26 : vector<8x1xf32>
    %28 = vector.broadcast %20 : vector<8x1xf32> to vector<8x32xf32>
    %29 = arith.subf %1, %28 : vector<8x32xf32>
    %cst_11 = arith.constant 9.99999997E-7 : f32
    %30 = vector.broadcast %cst_11 : f32 to vector<8x1xf32>
    %31 = arith.addf %27, %30 : vector<8x1xf32>
    %32 = math.rsqrt %31 : vector<8x1xf32>
    %33 = vector.broadcast %32 : vector<8x1xf32> to vector<8x32xf32>
    %34 = arith.mulf %29, %33 : vector<8x32xf32>
    %35 = vector.broadcast %7 : vector<1x32xf32> to vector<8x32xf32>
    %36 = arith.mulf %34, %35 : vector<8x32xf32>
    %37 = vector.broadcast %4 : vector<1x32xf32> to vector<8x32xf32>
    %38 = arith.addf %36, %37 : vector<8x32xf32>
    %39 = arith.truncf %38 : vector<8x32xf32> to vector<8x32xbf16>
    %c0_12 = arith.constant 0 : index
    %c0_13 = arith.constant 0 : index
    %40 = vector.load %arg5[%c0_12, %c0_13] : memref<32x32xbf16, #tpu.memory_space<vmem>>, vector<32x32xbf16>
    %cst_14 = arith.constant dense<0.000000e+00> : vector<8x32xf32>
    %41 = tpu.matmul %39, %40, %cst_14 {dimension_numbers = #tpu.dot_dimension_numbers<[1], [0], [0], [1], [0, 0, 1, 1], [], []>} : vector<8x32xbf16>, vector<32x32xbf16>, vector<8x32xf32> -> vector<8x32xf32>
    %c0_15 = arith.constant 0 : index
    %c0_16 = arith.constant 0 : index
    %42 = vector.load %arg6[%c0_15, %c0_16] : memref<1x32xf32, #tpu.memory_space<vmem>>, vector<1x32xf32>
    %43 = vector.broadcast %42 : vector<1x32xf32> to vector<8x32xf32>
    %44 = arith.addf %41, %43 : vector<8x32xf32>
    %45 = vector.extract_strided_slice %44 {offsets = [0, 0], sizes = [8, 8], strides = [1, 1]} : vector<8x32xf32> to vector<8x8xf32>
    %46 = vector.extract_strided_slice %44 {offsets = [0, 8], sizes = [8, 8], strides = [1, 1]} : vector<8x32xf32> to vector<8x8xf32>
    %47 = vector.extract_strided_slice %44 {offsets = [0, 16], sizes = [8, 8], strides = [1, 1]} : vector<8x32xf32> to vector<8x8xf32>
    %48 = vector.extract_strided_slice %44 {offsets = [0, 24], sizes = [8, 8], strides = [1, 1]} : vector<8x32xf32> to vector<8x8xf32>
    %49 = vector.shape_cast %45 : vector<8x8xf32> to vector<1x8x8xf32>
    %50 = vector.shape_cast %46 : vector<8x8xf32> to vector<1x8x8xf32>
    %51 = vector.shape_cast %47 : vector<8x8xf32> to vector<1x8x8xf32>
    %52 = vector.shape_cast %48 : vector<8x8xf32> to vector<1x8x8xf32>
    %53 = tpu.concatenate %49, %50, %51, %52 in 0 : vector<1x8x8xf32>, vector<1x8x8xf32>, vector<1x8x8xf32>, vector<1x8x8xf32> -> vector<4x8x8xf32>
    %c0_17 = arith.constant 0 : index
    %c0_18 = arith.constant 0 : index
    %c0_19 = arith.constant 0 : index
    %54 = vector.load %arg16[%c0_17, %c0_18, %c0_19] : memref<4x8x8xbf16, #tpu.memory_space<vmem>>, vector<4x8x8xbf16>
    %c0_20 = arith.constant 0 : index
    %c0_21 = arith.constant 0 : index
    %c0_22 = arith.constant 0 : index
    %55 = vector.load %arg17[%c0_20, %c0_21, %c0_22] : memref<4x8x8xbf16, #tpu.memory_space<vmem>>, vector<4x8x8xbf16>
    %56 = arith.truncf %53 : vector<4x8x8xf32> to vector<4x8x8xbf16>
    "tpu.trace_start"() <{level = 10 : i32, message = "hqd,hkd->hqk"}> : () -> ()
    %cst_23 = arith.constant dense<0.000000e+00> : vector<4x8x8xf32>
    %57 = tpu.matmul %56, %54, %cst_23 {dimension_numbers = #tpu.dot_dimension_numbers<[2], [2], [1], [1], [0, 0, 0, 1, 1, 1], [0], [0]>} : vector<4x8x8xbf16>, vector<4x8x8xbf16>, vector<4x8x8xf32> -> vector<4x8x8xf32>
    "tpu.trace_stop"() : () -> ()
    %cst_24 = arith.constant 0.353553385 : f32
    %58 = vector.broadcast %cst_24 : f32 to vector<4x8x8xf32>
    %59 = arith.mulf %57, %58 : vector<4x8x8xf32>
    %cst_25 = arith.constant dense<0xFF800000> : vector<4x8xf32>
    %60 = vector.multi_reduction <maximumf>, %59, %cst_25 [2] : vector<4x8x8xf32> to vector<4x8xf32>
    %61 = vector.shape_cast %60 : vector<4x8xf32> to vector<4x8x1xf32>
    %62 = vector.broadcast %61 : vector<4x8x1xf32> to vector<4x8x8xf32>
    %63 = arith.subf %59, %62 : vector<4x8x8xf32>
    %64 = math.exp %63 : vector<4x8x8xf32>
    %cst_26 = arith.constant dense<0.000000e+00> : vector<4x8xf32>
    %65 = vector.multi_reduction <add>, %64, %cst_26 [2] : vector<4x8x8xf32> to vector<4x8xf32>
    %66 = vector.shape_cast %65 : vector<4x8xf32> to vector<4x8x1xf32>
    %67 = tpu.reciprocal %66 {approx = true} : vector<4x8x1xf32> -> vector<4x8x1xf32>
    %68 = vector.broadcast %67 : vector<4x8x1xf32> to vector<4x8x8xf32>
    %69 = arith.mulf %64, %68 : vector<4x8x8xf32>
    %70 = arith.truncf %69 : vector<4x8x8xf32> to vector<4x8x8xbf16>
    "tpu.trace_start"() <{level = 10 : i32, message = "hqk,hkd->hqd"}> : () -> ()
    %cst_27 = arith.constant dense<0.000000e+00> : vector<4x8x8xf32>
    %71 = tpu.matmul %70, %55, %cst_27 {dimension_numbers = #tpu.dot_dimension_numbers<[2], [1], [1], [2], [0, 0, 0, 1, 1, 2], [0], [0]>} : vector<4x8x8xbf16>, vector<4x8x8xbf16>, vector<4x8x8xf32> -> vector<4x8x8xf32>
    "tpu.trace_stop"() : () -> ()
    %72 = vector.extract_strided_slice %71 {offsets = [0, 0, 0], sizes = [1, 8, 8], strides = [1, 1, 1]} : vector<4x8x8xf32> to vector<1x8x8xf32>
    %73 = vector.shape_cast %72 : vector<1x8x8xf32> to vector<8x8xf32>
    %74 = vector.extract_strided_slice %71 {offsets = [1, 0, 0], sizes = [1, 8, 8], strides = [1, 1, 1]} : vector<4x8x8xf32> to vector<1x8x8xf32>
    %75 = vector.shape_cast %74 : vector<1x8x8xf32> to vector<8x8xf32>
    %76 = vector.extract_strided_slice %71 {offsets = [2, 0, 0], sizes = [1, 8, 8], strides = [1, 1, 1]} : vector<4x8x8xf32> to vector<1x8x8xf32>
    %77 = vector.shape_cast %76 : vector<1x8x8xf32> to vector<8x8xf32>
    %78 = vector.extract_strided_slice %71 {offsets = [3, 0, 0], sizes = [1, 8, 8], strides = [1, 1, 1]} : vector<4x8x8xf32> to vector<1x8x8xf32>
    %79 = vector.shape_cast %78 : vector<1x8x8xf32> to vector<8x8xf32>
    %80 = tpu.concatenate %73, %75, %77, %79 in 1 : vector<8x8xf32>, vector<8x8xf32>, vector<8x8xf32>, vector<8x8xf32> -> vector<8x32xf32>
    %81 = arith.truncf %80 : vector<8x32xf32> to vector<8x32xbf16>
    %c0_28 = arith.constant 0 : index
    %c0_29 = arith.constant 0 : index
    %82 = vector.load %arg9[%c0_28, %c0_29] : memref<32x32xbf16, #tpu.memory_space<vmem>>, vector<32x32xbf16>
    %cst_30 = arith.constant dense<0.000000e+00> : vector<8x32xf32>
    %83 = tpu.matmul %81, %82, %cst_30 {dimension_numbers = #tpu.dot_dimension_numbers<[1], [0], [0], [1], [0, 0, 1, 1], [], []>} : vector<8x32xbf16>, vector<32x32xbf16>, vector<8x32xf32> -> vector<8x32xf32>
    %c0_31 = arith.constant 0 : index
    %c0_32 = arith.constant 0 : index
    %84 = vector.load %arg10[%c0_31, %c0_32] : memref<1x32xf32, #tpu.memory_space<vmem>>, vector<1x32xf32>
    %85 = vector.broadcast %84 : vector<1x32xf32> to vector<8x32xf32>
    %86 = arith.addf %83, %85 : vector<8x32xf32>
    %87 = vector.broadcast %8 : vector<1x32xf32> to vector<8x32xf32>
    %88 = arith.mulf %87, %86 : vector<8x32xf32>
    %89 = arith.addf %1, %88 : vector<8x32xf32>
    %cst_33 = arith.constant dense<0.000000e+00> : vector<8xf32>
    %90 = vector.multi_reduction <add>, %89, %cst_33 [1] : vector<8x32xf32> to vector<8xf32>
    %91 = vector.shape_cast %90 : vector<8xf32> to vector<8x1xf32>
    %cst_34 = arith.constant 3.200000e+01 : f32
    %92 = vector.broadcast %cst_34 : f32 to vector<8x1xf32>
    %93 = arith.divf %91, %92 : vector<8x1xf32>
    %94 = vector.broadcast %93 : vector<8x1xf32> to vector<8x32xf32>
    %95 = arith.subf %89, %94 : vector<8x32xf32>
    %96 = arith.mulf %95, %95 : vector<8x32xf32>
    %cst_35 = arith.constant dense<0.000000e+00> : vector<8xf32>
    %97 = vector.multi_reduction <add>, %96, %cst_35 [1] : vector<8x32xf32> to vector<8xf32>
    %98 = vector.shape_cast %97 : vector<8xf32> to vector<8x1xf32>
    %cst_36 = arith.constant 3.200000e+01 : f32
    %99 = vector.broadcast %cst_36 : f32 to vector<8x1xf32>
    %100 = arith.divf %98, %99 : vector<8x1xf32>
    %101 = vector.broadcast %93 : vector<8x1xf32> to vector<8x32xf32>
    %102 = arith.subf %89, %101 : vector<8x32xf32>
    %cst_37 = arith.constant 9.99999997E-7 : f32
    %103 = vector.broadcast %cst_37 : f32 to vector<8x1xf32>
    %104 = arith.addf %100, %103 : vector<8x1xf32>
    %105 = math.rsqrt %104 : vector<8x1xf32>
    %106 = vector.broadcast %105 : vector<8x1xf32> to vector<8x32xf32>
    %107 = arith.mulf %102, %106 : vector<8x32xf32>
    %108 = vector.broadcast %12 : vector<1x32xf32> to vector<8x32xf32>
    %109 = arith.mulf %107, %108 : vector<8x32xf32>
    %110 = vector.broadcast %9 : vector<1x32xf32> to vector<8x32xf32>
    %111 = arith.addf %109, %110 : vector<8x32xf32>
    %112 = arith.truncf %111 : vector<8x32xf32> to vector<8x32xbf16>
    %c0_38 = arith.constant 0 : index
    %c0_39 = arith.constant 0 : index
    %113 = vector.load %arg11[%c0_38, %c0_39] : memref<32x128xbf16, #tpu.memory_space<vmem>>, vector<32x128xbf16>
    %cst_40 = arith.constant dense<0.000000e+00> : vector<8x128xf32>
    %114 = tpu.matmul %112, %113, %cst_40 {dimension_numbers = #tpu.dot_dimension_numbers<[1], [0], [0], [1], [0, 0, 1, 1], [], []>} : vector<8x32xbf16>, vector<32x128xbf16>, vector<8x128xf32> -> vector<8x128xf32>
    %c0_41 = arith.constant 0 : index
    %c0_42 = arith.constant 0 : index
    %115 = vector.load %arg12[%c0_41, %c0_42] : memref<1x128xf32, #tpu.memory_space<vmem>>, vector<1x128xf32>
    %116 = vector.broadcast %115 : vector<1x128xf32> to vector<8x128xf32>
    %117 = arith.addf %114, %116 : vector<8x128xf32>
    %cst_43 = arith.constant 5.000000e-01 : f32
    %118 = vector.broadcast %cst_43 : f32 to vector<8x128xf32>
    %119 = arith.mulf %118, %117 : vector<8x128xf32>
    %cst_44 = arith.constant 4.471500e-02 : f32
    %120 = vector.broadcast %cst_44 : f32 to vector<8x128xf32>
    %121 = arith.mulf %120, %117 : vector<8x128xf32>
    %122 = arith.mulf %121, %117 : vector<8x128xf32>
    %123 = arith.mulf %122, %117 : vector<8x128xf32>
    %124 = arith.addf %117, %123 : vector<8x128xf32>
    %cst_45 = arith.constant 0.797884583 : f32
    %125 = vector.broadcast %cst_45 : f32 to vector<8x128xf32>
    %126 = arith.mulf %125, %124 : vector<8x128xf32>
    %127 = math.tanh %126 : vector<8x128xf32>
    %cst_46 = arith.constant 1.000000e+00 : f32
    %128 = vector.broadcast %cst_46 : f32 to vector<8x128xf32>
    %129 = arith.addf %128, %127 : vector<8x128xf32>
    %130 = arith.mulf %119, %129 : vector<8x128xf32>
    %131 = arith.truncf %130 : vector<8x128xf32> to vector<8x128xbf16>
    %c0_47 = arith.constant 0 : index
    %c0_48 = arith.constant 0 : index
    %132 = vector.load %arg13[%c0_47, %c0_48] : memref<128x32xbf16, #tpu.memory_space<vmem>>, vector<128x32xbf16>
    %cst_49 = arith.constant dense<0.000000e+00> : vector<8x32xf32>
    %133 = tpu.matmul %131, %132, %cst_49 {dimension_numbers = #tpu.dot_dimension_numbers<[1], [0], [0], [1], [0, 0, 1, 1], [], []>} : vector<8x128xbf16>, vector<128x32xbf16>, vector<8x32xf32> -> vector<8x32xf32>
    %c0_50 = arith.constant 0 : index
    %c0_51 = arith.constant 0 : index
    %134 = vector.load %arg14[%c0_50, %c0_51] : memref<1x32xf32, #tpu.memory_space<vmem>>, vector<1x32xf32>
    %135 = vector.broadcast %134 : vector<1x32xf32> to vector<8x32xf32>
    %136 = arith.addf %133, %135 : vector<8x32xf32>
    %137 = vector.broadcast %13 : vector<1x32xf32> to vector<8x32xf32>
    %138 = arith.mulf %137, %136 : vector<8x32xf32>
    %139 = arith.addf %89, %138 : vector<8x32xf32>
    %c0_52 = arith.constant 0 : index
    %c0_53 = arith.constant 0 : index
    %c0_54 = arith.constant 0 : index
    %140 = vector.load %arg15[%c0_52, %c0_53, %c0_54] : memref<1x8x32xf32, #tpu.memory_space<vmem>>, vector<1x8x32xf32>
    %141 = vector.shape_cast %140 : vector<1x8x32xf32> to vector<8x32xf32>
    %142 = vector.shape_cast %139 : vector<8x32xf32> to vector<1x8x32xf32>
    tpu.vector_store %arg15[%c0_52, %c0_53, %c0_54], %142 {strides = array<i32>} : memref<1x8x32xf32, #tpu.memory_space<vmem>>, vector<1x8x32xf32>,
    return
  }
  func.func @transform_0(%arg0: i32, %arg1: i32) -> (i32, i32, i32) {
    %c0_i32 = arith.constant 0 : i32
    %c0_i32_0 = arith.constant 0 : i32
    return %arg0, %arg1, %c0_i32 : i32, i32, i32
  }
  func.func @transform_1(%arg0: i32, %arg1: i32) -> (i32, i32, i32) {
    %c0_i32 = arith.constant 0 : i32
    %c0_i32_0 = arith.constant 0 : i32
    %c0_i32_1 = arith.constant 0 : i32
    return %arg0, %c0_i32, %c0_i32_0 : i32, i32, i32
  }
  func.func @transform_2(%arg0: i32, %arg1: i32) -> (i32, i32, i32) {
    %c0_i32 = arith.constant 0 : i32
    %c0_i32_0 = arith.constant 0 : i32
    %c0_i32_1 = arith.constant 0 : i32
    return %arg0, %c0_i32, %c0_i32_0 : i32, i32, i32
  }
  func.func @transform_3(%arg0: i32, %arg1: i32) -> (i32, i32) {
    %c0_i32 = arith.constant 0 : i32
    %c0_i32_0 = arith.constant 0 : i32
    %c0_i32_1 = arith.constant 0 : i32
    return %c0_i32, %c0_i32_0 : i32, i32
  }
  func.func @transform_4(%arg0: i32, %arg1: i32) -> (i32, i32) {
    %c0_i32 = arith.constant 0 : i32
    %c0_i32_0 = arith.constant 0 : i32
    %c0_i32_1 = arith.constant 0 : i32
    return %c0_i32, %c0_i32_0 : i32, i32
  }
  func.func @transform_5(%arg0: i32, %arg1: i32) -> (i32, i32) {
    %c0_i32 = arith.constant 0 : i32
    %c0_i32_0 = arith.constant 0 : i32
    %c0_i32_1 = arith.constant 0 : i32
    return %c0_i32, %c0_i32_0 : i32, i32
  }
  func.func @transform_6(%arg0: i32, %arg1: i32) -> (i32, i32) {
    %c0_i32 = arith.constant 0 : i32
    %c0_i32_0 = arith.constant 0 : i32
    %c0_i32_1 = arith.constant 0 : i32
    return %c0_i32, %c0_i32_0 : i32, i32
  }
  func.func @transform_7(%arg0: i32, %arg1: i32) -> (i32, i32) {
    %c0_i32 = arith.constant 0 : i32
    %c0_i32_0 = arith.constant 0 : i32
    %c0_i32_1 = arith.constant 0 : i32
    return %c0_i32, %c0_i32_0 : i32, i32
  }
  func.func @transform_8(%arg0: i32, %arg1: i32) -> (i32, i32) {
    %c0_i32 = arith.constant 0 : i32
    %c0_i32_0 = arith.constant 0 : i32
    %c0_i32_1 = arith.constant 0 : i32
    return %c0_i32, %c0_i32_0 : i32, i32
  }
  func.func @transform_9(%arg0: i32, %arg1: i32) -> (i32, i32) {
    %c0_i32 = arith.constant 0 : i32
    %c0_i32_0 = arith.constant 0 : i32
    %c0_i32_1 = arith.constant 0 : i32
    return %c0_i32, %c0_i32_0 : i32, i32
  }
  func.func @transform_10(%arg0: i32, %arg1: i32) -> (i32, i32) {
    %c0_i32 = arith.constant 0 : i32
    %c0_i32_0 = arith.constant 0 : i32
    %c0_i32_1 = arith.constant 0 : i32
    return %c0_i32, %c0_i32_0 : i32, i32
  }
  func.func @transform_11(%arg0: i32, %arg1: i32) -> (i32, i32) {
    %c0_i32 = arith.constant 0 : i32
    %c0_i32_0 = arith.constant 0 : i32
    %c0_i32_1 = arith.constant 0 : i32
    return %c0_i32, %c0_i32_0 : i32, i32
  }
  func.func @transform_12(%arg0: i32, %arg1: i32) -> (i32, i32) {
    %c0_i32 = arith.constant 0 : i32
    %c0_i32_0 = arith.constant 0 : i32
    %c0_i32_1 = arith.constant 0 : i32
    return %c0_i32, %c0_i32_0 : i32, i32
  }
  func.func @transform_13(%arg0: i32, %arg1: i32) -> (i32, i32, i32) {
    %c0_i32 = arith.constant 0 : i32
    %c0_i32_0 = arith.constant 0 : i32
    return %arg0, %arg1, %c0_i32 : i32, i32, i32
  }
}

</mosaic_0001>

<bundles_post_ra>
// kernel: tpu_custom_call.1
= control target key start
LH: loop header
LB: loop body
LE: loop exit
PB: predicated region body
PF: predicated region fallthrough
CT: control target
= control target key end

     0   :  { %s2355_s0 = inlined_call_operand.vmem [shape: f32[2,8,32], index: 0, kind: input, shape index: {}]   ;;  %s2356_s1 = inlined_call_operand.vmem [shape: f32[2,8,32], index: 1, kind: input, shape index: {}]   ;;  %s2357_s2 = inlined_call_operand.vmem [shape: f32[2,6,32], index: 2, kind: input, shape index: {}]   ;;  %s2358_s3 = inlined_call_operand.vmem [shape: bf16[32,32], index: 3, kind: input, shape index: {}]   ;;  %s2359_s4 = inlined_call_operand.vmem [shape: f32[1,32], index: 4, kind: input, shape index: {}]   ;;  %s2360_s5 = inlined_call_operand.vmem [shape: bf16[32,64], index: 5, kind: input, shape index: {}]   ;;  %s2361_s6 = inlined_call_operand.vmem [shape: f32[1,64], index: 6, kind: input, shape index: {}]   ;;  %s2362_s7 = inlined_call_operand.vmem [shape: bf16[32,32], index: 7, kind: input, shape index: {}]   ;;  %s2363_s8 = inlined_call_operand.vmem [shape: f32[1,32], index: 8, kind: input, shape index: {}]   ;;  %s2364_s9 = inlined_call_operand.vmem [shape: bf16[32,128], index: 9, kind: input, shape index: {}]   ;;  %s2365_s10 = inlined_call_operand.vmem [shape: f32[1,128], index: 10, kind: input, shape index: {}]   ;;  %s2366_s11 = inlined_call_operand.vmem [shape: bf16[128,32], index: 11, kind: input, shape index: {}]   ;;  %s2367_s12 = inlined_call_operand.vmem [shape: f32[1,32], index: 12, kind: input, shape index: {}]   ;;  %s2368_s13 = inlined_call_operand.hbm [shape: f32[2,8,32], index: 13, kind: output, shape index: {}]  }
   0x1   :  { %2370 = sst [smem:[#allocation8_spill]] %s2355_s0 }
   0x2   :  { %2371 = sst [smem:[#allocation9_spill]] %s2356_s1 }
   0x3   :  { %2372 = sst [smem:[#allocation10_spill]] %s2357_s2 }
   0x4   :  { %18 = vsyncpa [#allocation5], 0 }
   0x5   :  { %20 = vsyncpa [#allocation5 + $0x1], 0  ;;  %s2043_s25 = smov 0   ;;  %s2045_s26 = smov 0  }
   0x6   :  { %s2047_s27 = smov 0   ;;  %s2049_s28 = smov 0  }
   0x7   :  { %s2051_s29 = smov 0   ;;  %s2053_s30 = smov 0  }
   0x8 LB: > { %s1590_s14 = sadd.s32 4294967295, %s1958_s30   ;;  %s1591_s15 = sadd.s32 4294967294, %s1958_s30   ;;  %s1958_s30 = sphi %s2053_s30, %s26_s30   ;;  %s1954_s29 = sphi %s2051_s29, %s2384_s29   ;;  %s1950_s28 = sphi %s2049_s28, %s2383_s28   ;;  %s1946_s27 = sphi %s2047_s27, %s2382_s27   ;;  %s1942_s26 = sphi %s2045_s26, %s2381_s26   ;;  %s1938_s25 = sphi %s2043_s25, %s2380_s25  }
   0x9   : > { %s38_s16 = sadd.s32 1, %s1954_s29  ;;  %s337_s17 = sadd.s32 1, %s1946_s27 }
   0xa   : > { %p40_p0 = scmp.ge.s32.totalorder %s38_s16, 2  ;;  %p347_p1 = scmp.ne.s32.totalorder %s1946_s27, %s1942_s26 }
   0xb   : > { %p348_p2 = scmp.eq.s32.totalorder %s1590_s14, 1  ;;  %p353_p3 = scmp.ne.s32.totalorder %s1942_s26, %s1938_s25 }
   0xc   : > { %s2386_s16 = smov (%p40_p0, %s38_s16), 0  ;;  %p354_p5 = scmp.eq.s32.totalorder %s1591_s15, 1 }
   0xd   : > { %2373 = sst [smem:[#allocation7_spill]] %s2386_s16  ;;  %p2083_p4 = por %p348_p2, %p347_p1 }
   0xe   : > { %s332_s19 = ssub.s32 %s1954_s29, %s2386_s16  ;;  %p1594_p6 = scmp.ge.s32.totalorder %s1958_s30, 1 }
   0xf   : > { %p335_p7 = scmp.eq.s32.totalorder %s332_s19, 0  ;;  %p2090_p8 = por %p354_p5, %p353_p3 }
  0x10   : > { %p426_p9 = scmp.lt.s32.totalorder %s1958_s30, 3 }
  0x11   : > { %s2096_s21 = scalar_select %p335_p7, %s1946_s27, %s337_s17  }
  0x12   : > { %p427_p10 = pnand %p1594_p6, %p426_p9 }
  0x13   : > { %p480_p11 = scmp.lt.s32.totalorder (!%p427_p10), %s1950_s28, 1  ;;  %s2376_s1 = sld [smem:[#allocation9_spill]] (!%p427_p10) }
  0x14   : > { %430 = sbr.rel (%p427_p10) target bundleno = 2491 (0x9bb), region = 72  ;;  %s2377_s0 = sld [smem:[#allocation8_spill]] (!%p427_p10) }
  0x15   : > { %s2378_s2 = sld [smem:[#allocation10_spill]] (!%p427_p10)  ;;  %s1962_s19 = smov (!%p427_p10), 120  }
  0x16   : > { %s1965_s24 = smov (!%p427_p10), 88   ;;  %s1966_s14 = smov (!%p427_p10), 80  }
  0x17   : > { %s1969_s16 = smov (!%p427_p10), 8  }
  0x19   : > { %s481_s22 = scalar_select %p480_p11, %s1950_s28, 1  ;;  %vm504_vm0 = vcmask 261120   ;;  %v1842_v14 = vld [vmem:[%s2360_s5 + $0x8] sm:$0xff]   ;;  %v1960_v15 = vmov 0.0   ;;  %v1843_v16 = vld [vmem:[%s2360_s5] sm:$0xff]   ;;  %vm1961_vm1 = vmmov 0   ;;  %v519_v21 = vlaneseq }
  0x1a   : > { %1675 = vmatprep.subr.bf16.mxu1 %v1960_v15  ;;  %1703 = vmatprep.subr.bf16.mxu0 %v1960_v15  ;;  %v1844_v37 = vld [vmem:[%s2358_s3 + $0x8] sm:$0xff]   ;;  %v1845_v40 = vld [vmem:[%s2358_s3] sm:$0xff]   ;;  %vm597_vm2 = vcmask 60416   ;;  %vm750_vm3 = vcmask 64512   ;;  %vm990_vm4 = vcmask 1043456   ;;  %vm1185_vm5 = vcmask 130048  }
  0x1b   : > { %s2100_s23 = sshll.u32 %s481_s22, 3  ;;  %1676 = vmatpush3.bf16.msra.mxu1 %v1842_v14  ;;  %1679 = vmatprep.mubr.msk.bf16.mxu1 %vm1961_vm1, %v1960_v15  ;;  %v2136_v24 = vshrl.u32 %v519_v21, 7  ;;  %v1599_v43 = vld [vmem:[%s2361_s6] ss:$0 sm:$0xff]  ;;  %s1964_s22 = smov 104   ;;  %vm1187_vm6 = vcmask 195584  }
  0x1c   : > { %s490_s15 = scalar_lea.vmem %s2376_s1, %s2100_s23  ;;  %s486_s17 = scalar_lea.vmem %s2377_s0, %s2100_s23  ;;  %1677 = vmatprep.subr.bf16.mxu1 %v1960_v15  ;;  %1705 = vmatprep.mubr.msk.bf16.mxu0 %vm1961_vm1, %v1960_v15  ;;  %v1604_v50 = vld [vmem:[%s2359_s4] ss:$0 sm:$0xff] }
  0x1d   : > { %v503_v0 = vld [vmem:[%s490_s15] sm:$0xff]  ;;  %v521_v27 = vsub.s32 1, %v2136_v24  ;;  %v526_v28 = vsub.s32 0, %v2136_v24  ;;  %s1967_s15 = smov 96  }
  0x1e   : > { %v505_v1 = vsel %vm504_vm0, %v503_v0, 0.0  ;;  %v2111_v2 = vld [vmem:[%s486_s17] sm:$0xff]  ;;  %s494_s17 = scalar_lea.vmem %s2378_s2, %s2100_s23 }
  0x1f   : > { %506 = vadd.xlane.f32.xlu0 %v505_v1  ;;  %v637_v3 = vsel %vm504_vm0, %v2111_v2, 0.0  ;;  %1678 = vmatpush3.bf16.msra.mxu1 %v1843_v16  ;;  %v2138_v25 = vld [vmem:[%s494_s17] sm:$0x3f]  ;;  %s1963_s17 = smov 112  }
  0x20   : > { %1683 = vmatprep.subr.bf16.mxu1 %v1960_v15  ;;  %v2141_v26 = vadd.f32 1.0, %v2138_v25  ;;  %v527_v32 = vrot.slane %v2138_v25, %v526_v28 }
  0x22   : > { %v522_v29 = vrot.slane %v2141_v26, %v521_v27 }
  0x23   : > { %638 = vadd.xlane.f32.xlu0 %v637_v3 }
  0xa8   : > { %v507_v4 = vpop.xlane.xlu0 %506 }
  0xa9   : > { %v509_v5 = vmul.f32 0.03125, %v507_v4 }
  0xab   : > { %v510_v6 = vsub.f32 %v503_v0, %v509_v5 }
  0xac   : > { %v639_v7 = vpop.xlane.xlu0 %638 }
  0xad   : > { %v641_v8 = vmul.f32 0.03125, %v639_v7  ;;  %v511_v9 = vmul.f32 %v510_v6, %v510_v6 }
  0xaf   : > { %v642_v10 = vsub.f32 %v2111_v2, %v641_v8  ;;  %v512_v11 = vsel %vm504_vm0, %v511_v9, 0.0 }
  0xb0   : > { %513 = vadd.xlane.f32.xlu1 %v512_v11 }
  0xb1   : > { %v643_v12 = vmul.f32 %v642_v10, %v642_v10 }
  0xb3   : > { %v644_v13 = vsel %vm504_vm0, %v643_v12, 0.0 }
  0xb4   : > { %645 = vadd.xlane.f32.xlu1 %v644_v13 }
 0x139   : > { %v514_v17 = vpop.xlane.xlu1 %513 }
 0x13a   : > { %v515_v18 = vmul.f32 0.03125, %v514_v17 }
 0x13c   : > { %v516_v19 = vadd.f32 1e-06, %v515_v18 }
 0x13d   : > { %v646_v20 = vpop.xlane.xlu1 %645 }
 0x13e   : > { %1858 = vrsqrt.f32 %v516_v19  ;;  %v647_v22 = vmul.f32 0.03125, %v646_v20 }
 0x140   : > { %v648_v23 = vadd.f32 1e-06, %v647_v22 }
 0x142   : > { %1860 = vrsqrt.f32 %v648_v23 }
 0x14b   : > { %v1859_v30 = vpop.eup %1858 }
 0x14c   : > { %v518_v31 = vmul.f32 %v1859_v30, %v510_v6 }
 0x14e   : > { %v523_v33 = vmul.f32 %v522_v29, %v518_v31 }
 0x14f   : > { %v1861_v34 = vpop.eup %1860 }
 0x150   : > { %v650_v35 = vmul.f32 %v1861_v34, %v642_v10  ;;  %v528_v36 = vadd.f32 %v527_v32, %v523_v33 }
 0x152   : > { %v529_v38 = vpack.c.bf16 %v528_v36, %v528_v36  ;;  %v655_v39 = vmul.f32 %v650_v35, %v522_v29 }
 0x154   : > { %1680 = vmatmul.mubr.msk.bf16.vlgmr.msra.gmra.mxu1 %vm504_vm0, %v529_v38  ;;  %v660_v41 = vadd.f32 %v655_v39, %v527_v32 }
 0x155   : > { %1684 = vmatpush3.bf16.msra.mxu1 %v1844_v37  ;;  %1687 = vmatprep.mubr.msk.bf16.mxu1 %vm1961_vm1, %v1960_v15 }
 0x156   : > { %1685 = vmatprep.subr.bf16.mxu1 %v1960_v15  ;;  %v661_v42 = vpack.c.bf16 %v660_v41, %v660_v41 }
 0x159   : > { %1686 = vmatpush3.bf16.msra.mxu1 %v1845_v40 }
 0x15a   : > { %1691 = vmatprep.subr.bf16.mxu1 %v1960_v15 }
 0x15c   : > { %1688 = vmatmul.mubr.msk.bf16.vlgmr.msra.gmra.mxu1 %vm504_vm0, %v661_v42 }
 0x15d   : > { %1693 = vmatprep.mubr.msk.bf16.mxu1 %vm1961_vm1, %v1960_v15 }
 0x214   : > { %v590_v44 = vpop.f32.mrf.mxu1 }
 0x215   : > { %v591_v45 = vadd.f32 %v1599_v43, %v590_v44 }
 0x216   : > { %v1681_v46 = vpop.f32.mrf.mxu1 }
 0x217   : > { %v2164_v47 = vpack.c.bf16 %v591_v45, %v591_v45 }
 0x218   : > { %v593_v48 = vpop.f32.mrf.mxu1 }
 0x219   : > { %598 = vst.msk [vmem:[#allocation2] sm:$0xf] %vm597_vm2, %v2164_v47  ;;  %606 = vrot.lane.b32.xlu0 %v2164_v47, %s1962_s19  ;;  %616 = vrot.lane.b32.xlu1 %v2164_v47, %s1963_s17 }
 0x21a   : > { %v1682_v49 = vpop.f32.mrf.mxu1 }
 0x21c   : > { %v722_v51 = vpop.f32.mrf.mxu1 }
 0x21d   : > { %v723_v52 = vadd.f32 %v1604_v50, %v722_v51  ;;  %626 = vrot.lane.b32.xlu1 %v2164_v47, %s1964_s22 }
 0x21e   : > { %v1689_v53 = vpop.f32.mrf.mxu1 }
 0x21f   : > { %732 = vrot.lane.b32.xlu0 %v723_v52, %s1963_s17  ;;  %v746_v58 = vpack.c.bf16 %v723_v52, %v723_v52 }
 0x220   : > { %v725_v54 = vpop.f32.mrf.mxu1  ;;  %v738_v55 = vld [vmem:[#allocation2] sm:$0xf] }
 0x221   : > { %729 = vrot.lane.b32.xlu1 %v723_v52, %s1962_s19  ;;  %v755_v56 = vsel %vm750_vm3, %v738_v55, 0  ;;  %s1968_s19 = smov 72  }
 0x222   : > { %v1690_v57 = vpop.f32.mrf.mxu1  ;;  %1692 = vmatpush3.bf16.xpose.msra.mxu1 %v755_v56 }
 0x223   : > { %1697 = vmatprep.subr.bf16.mxu1 %v1960_v15 }
 0x225   : > { %735 = vrot.lane.b32.xlu1 %v723_v52, %s1964_s22  ;;  %s1970_s22 = smov 16  }
 0x229   : > { %1694 = vmatmul.mubr.msk.bf16.vlgmr.msra.gmra.mxu1 %vm750_vm3, %v746_v58 }
 0x22a   : > { %1699 = vmatprep.mubr.msk.bf16.mxu1 %vm1961_vm1, %v1960_v15 }
 0x28b   : > { %v617_v59 = vpop.permute.xlu1 %616  ;;  %v607_v60 = vpop.permute.xlu0 %606 }
 0x28c   : > { %620 = vst.msk [vmem:[#allocation2 + $0x8] sm:$0xf] %vm597_vm2, %v617_v59  ;;  %610 = vst.msk [vmem:[#allocation2 + $0x4] sm:$0xf] %vm597_vm2, %v607_v60 }
 0x28f   : > { %v627_v61 = vpop.permute.xlu1 %626 }
 0x290   : > { %630 = vst.msk [vmem:[#allocation2 + $0xc] sm:$0xf] %vm597_vm2, %v627_v61 }
 0x291   : > { %v733_v3 = vpop.permute.xlu0 %732 }
 0x292   : > { %v748_v6 = vpack.c.bf16 %v733_v3, %v733_v3 }
 0x293   : > { %v739_v62 = vld [vmem:[#allocation2 + $0x4] sm:$0xf]  ;;  %v740_v63 = vld [vmem:[#allocation2 + $0x8] sm:$0xf]  ;;  %v730_v4 = vpop.permute.xlu1 %729 }
 0x294   : > { %v801_v0 = vsel %vm750_vm3, %v739_v62, 0  ;;  %v847_v1 = vsel %vm750_vm3, %v740_v63, 0  ;;  %v747_v7 = vpack.c.bf16 %v730_v4, %v730_v4 }
 0x295   : > { %1698 = vmatpush3.bf16.xpose.msra.mxu1 %v801_v0  ;;  %1704 = vmatpush3.bf16.xpose.msra.mxu0 %v847_v1 }
 0x296   : > { %1709 = vmatprep.subr.bf16.mxu1 %v1960_v15  ;;  %1715 = vmatprep.subr.bf16.mxu0 %v1960_v15 }
 0x297   : > { %v741_v5 = vld [vmem:[#allocation2 + $0xc] sm:$0xf]  ;;  %v736_v9 = vpop.permute.xlu1 %735 }
 0x298   : > { %v893_v8 = vsel %vm750_vm3, %v741_v5, 0  ;;  %v749_v10 = vpack.c.bf16 %v736_v9, %v736_v9 }
 0x29c   : > { %1700 = vmatmul.mubr.msk.bf16.vlgmr.msra.gmra.mxu1 %vm750_vm3, %v747_v7  ;;  %1706 = vmatmul.mubr.msk.bf16.vlgmr.msra.gmra.mxu0 %vm750_vm3, %v748_v6 }
 0x29d   : > { %1710 = vmatpush3.bf16.xpose.msra.mxu1 %v893_v8  ;;  %1711 = vmatprep.mubr.msk.bf16.mxu1 %vm1961_vm1, %v1960_v15 }
 0x29e   : > { %1721 = vmatprep.subr.bf16.mxu1 %v1960_v15  ;;  %1717 = vmatprep.mubr.msk.bf16.mxu0 %vm1961_vm1, %v1960_v15 }
 0x2a4   : > { %1712 = vmatmul.mubr.msk.bf16.vlgmr.msra.gmra.mxu1 %vm750_vm3, %v749_v10 }
 0x2a5   : > { %1723 = vmatprep.mubr.msk.bf16.mxu1 %vm1961_vm1, %v1960_v15 }
 0x2e9   : > { %v791_v11 = vpop.f32.mrf.mxu1 }
 0x2ea   : > { %v935_v12 = vmul.f32 0.35355338, %v791_v11 }
 0x2eb   : > { %v1695_v13 = vpop.f32.mrf.mxu1 }
 0x2ec   : > { %v939_v14 = vsel %vm750_vm3, %v935_v12, -inf }
 0x2ed   : > { %940 = vmax.xlane.f32.xlu0 %v939_v14  ;;  %v794_v16 = vpop.f32.mrf.mxu1 }
 0x2ef   : > { %v1696_v17 = vpop.f32.mrf.mxu1 }
 0x35c   : > { %v837_v18 = vpop.f32.mrf.mxu1  ;;  %v883_v19 = vpop.f32.mrf.mxu0 }
 0x35d   : > { %v936_v20 = vmul.f32 0.35355338, %v837_v18  ;;  %v937_v21 = vmul.f32 0.35355338, %v883_v19 }
 0x35e   : > { %v1701_v22 = vpop.f32.mrf.mxu1  ;;  %v1707_v23 = vpop.f32.mrf.mxu0 }
 0x35f   : > { %v942_v27 = vsel %vm750_vm3, %v936_v20, -inf  ;;  %v945_v28 = vsel %vm750_vm3, %v937_v21, -inf }
 0x360   : > { %943 = vmax.xlane.f32.xlu1 %v942_v27  ;;  %v840_v29 = vpop.f32.mrf.mxu1  ;;  %946 = vmax.xlane.f32.xlu0 %v945_v28  ;;  %v886_v30 = vpop.f32.mrf.mxu0  ;;  %v1846_v28 = vld [vmem:[%s2362_s7 + $0x8] sm:$0xff]  }
 0x362   : > { %v1702_v31 = vpop.f32.mrf.mxu1  ;;  %v1708_v32 = vpop.f32.mrf.mxu0 }
 0x364   : > { %v929_v33 = vpop.f32.mrf.mxu1 }
 0x365   : > { %v938_v34 = vmul.f32 0.35355338, %v929_v33 }
 0x366   : > { %v1713_v35 = vpop.f32.mrf.mxu1 }
 0x367   : > { %v948_v36 = vsel %vm750_vm3, %v938_v34, -inf }
 0x368   : > { %v932_v37 = vpop.f32.mrf.mxu1  ;;  %949 = vmax.xlane.f32.xlu0 %v948_v36 }
 0x36a   : > { %v1714_v38 = vpop.f32.mrf.mxu1 }
 0x376   : > { %v941_v39 = vpop.xlane.xlu0 %940 }
 0x377   : > { %v951_v40 = vsub.f32 %v935_v12, %v941_v39 }
 0x379   : > { %v955_v41 = vmul.f32 1.442695, %v951_v40 }
 0x37b   : > { %1862 = vpow2.f32 %v955_v41  ;;  %v1847_v41 = vld [vmem:[%s2362_s7] sm:$0xff]  }
 0x388   : > { %v1863_v42 = vpop.eup %1862 }
 0x389   : > { %v963_v43 = vsel %vm750_vm3, %v1863_v42, 0.0 }
 0x38a   : > { %964 = vadd.xlane.f32.xlu0 %v963_v43 }
 0x3e9   : > { %v944_v44 = vpop.xlane.xlu1 %943  ;;  %v947_v45 = vpop.xlane.xlu0 %946 }
 0x3ea   : > { %v952_v46 = vsub.f32 %v936_v20, %v944_v44  ;;  %v953_v48 = vsub.f32 %v937_v21, %v947_v45 }
 0x3ec   : > { %v957_v49 = vmul.f32 1.442695, %v952_v46  ;;  %v959_v50 = vmul.f32 1.442695, %v953_v48 }
 0x3ee   : > { %1864 = vpow2.f32 %v957_v49 }
 0x3ef   : > { %1866 = vpow2.f32 %v959_v50 }
 0x3f1   : > { %v950_v55 = vpop.xlane.xlu0 %949 }
 0x3f2   : > { %v954_v56 = vsub.f32 %v938_v34, %v950_v55  ;;  %v1616_v55 = vld [vmem:[%s2363_s8] ss:$0 sm:$0xff] }
 0x3f4   : > { %v961_v57 = vmul.f32 1.442695, %v954_v56 }
 0x3f6   : > { %1868 = vpow2.f32 %v961_v57 }
 0x3fb   : > { %v1865_v51 = vpop.eup %1864 }
 0x3fc   : > { %v1867_v52 = vpop.eup %1866  ;;  %v966_v53 = vsel %vm750_vm3, %v1865_v51, 0.0 }
 0x3fd   : > { %967 = vadd.xlane.f32.xlu1 %v966_v53  ;;  %v969_v54 = vsel %vm750_vm3, %v1867_v52, 0.0 }
 0x3fe   : > { %970 = vadd.xlane.f32.xlu0 %v969_v54  ;;  %v1258_v54 = vsub.s32 2, %v2136_v24 }
 0x400   : > { %v1259_v56 = vrot.slane %v2138_v25, %v1258_v54 }
 0x403   : > { %v1869_v58 = vpop.eup %1868 }
 0x404   : > { %v972_v59 = vsel %vm750_vm3, %v1869_v58, 0.0 }
 0x40e   : > { %611 = vrot.lane.b32.xlu1 %v2164_v47, %s1965_s24 }
 0x412   : > { %621 = vrot.lane.b32.xlu1 %v2164_v47, %s1966_s14 }
 0x413   : > { %v965_v60 = vpop.xlane.xlu0 %964 }
 0x414   : > { %602 = vrot.lane.b32.xlu0 %v2164_v47, %s1967_s15  ;;  %1870 = vrcp.f32 %v965_v60  ;;  %s1971_s15 = smov 24  }
 0x421   : > { %v1871_v3 = vpop.eup %1870 }
 0x422   : > { %v979_v5 = vmul.f32 %v1871_v3, %v1863_v42 }
 0x424   : > { %v983_v10 = vpack.c.bf16 %v979_v5, %v979_v5 }
 0x436   : > { %973 = vadd.xlane.f32.xlu1 %v972_v59 }
 0x447   : > { %631 = vrot.lane.b32.xlu1 %v2164_v47, %s1968_s19  ;;  %s477_s19 = sand.u32 1, %s1942_s26  }
 0x448   : > { %s1595_s17 = sshll.u32 %s477_s19, 3  ;;  %s1481_s23 = scalar_lea.sflag [#allocation5], %s477_s19 }
 0x449   : > { %s479_s24 = scalar_lea.vmem [#allocation4], %s1595_s17 }
 0x44a   : > { %s1495_s14 = sshll.u32 %s479_s24, 4  ;;  %s1496_s14 = int_to_ptr.vmem [resolvable:$true] %s1495_s14 }
 0x486   : > { %v968_v61 = vpop.xlane.xlu1 %967 }
 0x487   : > { %1872 = vrcp.f32 %v968_v61  ;;  %v971_v62 = vpop.xlane.xlu0 %970 }
 0x488   : > { %1874 = vrcp.f32 %v971_v62 }
 0x48a   : > { %v612_v63 = vpop.permute.xlu1 %611 }
 0x48b   : > { %615 = vst.msk [vmem:[#allocation3 + $0x4] sm:$0xf] %vm597_vm2, %v612_v63  ;;  %v603_v0 = vpop.permute.xlu0 %602 }
 0x48c   : > { %605 = vst.msk [vmem:[#allocation3] sm:$0xf] %vm597_vm2, %v603_v0 }
 0x48e   : > { %v622_v1 = vpop.permute.xlu1 %621 }
 0x48f   : > { %625 = vst.msk [vmem:[#allocation3 + $0x8] sm:$0xf] %vm597_vm2, %v622_v1 }
 0x492   : > { %v743_v4 = vld [vmem:[#allocation3 + $0x4] sm:$0xf] }
 0x493   : > { %v742_v47 = vld [vmem:[#allocation3] sm:$0xf]  ;;  %v1038_v6 = vsel %vm990_vm4, %v743_v4, 0 }
 0x494   : > { %v1873_v7 = vpop.eup %1872  ;;  %v992_v8 = vsel %vm990_vm4, %v742_v47, 0  ;;  %1722 = vmatpush3.bf16.msra.mxu1 %v1038_v6  ;;  %v1848_v6 = vld [vmem:[%s2364_s9 + $0x8] sm:$0xff]  }
 0x495   : > { %1716 = vmatpush3.bf16.msra.mxu0 %v992_v8  ;;  %v980_v9 = vmul.f32 %v1873_v7, %v1865_v51  ;;  %1733 = vmatprep.subr.bf16.mxu1 %v1960_v15  ;;  %v1875_v12 = vpop.eup %1874 }
 0x496   : > { %1727 = vmatprep.subr.bf16.mxu0 %v1960_v15  ;;  %v744_v11 = vld [vmem:[#allocation3 + $0x8] sm:$0xf]  ;;  %v981_v16 = vmul.f32 %v1875_v12, %v1867_v52 }
 0x497   : > { %v1084_v13 = vsel %vm990_vm4, %v744_v11, 0  ;;  %v984_v14 = vpack.c.bf16 %v980_v9, %v980_v9  ;;  %v1282_v11 = vsub.s32 3, %v2136_v24 }
 0x498   : > { %1718 = vmatmul.mubr.msk.bf16.vlgmr.msra.gmra.mxu0 %vm750_vm3, %v983_v10  ;;  %v985_v17 = vpack.c.bf16 %v981_v16, %v981_v16  ;;  %v1277_v10 = vsub.s32 4, %v2136_v24 }
 0x499   : > { %1728 = vmatpush3.bf16.msra.mxu0 %v1084_v13  ;;  %1724 = vmatmul.mubr.msk.bf16.vlgmr.msra.gmra.mxu1 %vm750_vm3, %v984_v14  ;;  %v1283_v14 = vrot.slane %v2138_v25, %v1282_v11 }
 0x49a   : > { %1729 = vmatprep.mubr.msk.bf16.mxu0 %vm1961_vm1, %v1960_v15  ;;  %1735 = vmatprep.mubr.msk.bf16.mxu1 %vm1961_vm1, %v1960_v15  ;;  %v1278_v12 = vrot.slane %v2141_v26, %v1277_v10  ;;  %v1851_v26 = vld [vmem:[%s2366_s11 + $0x30] sm:$0xff]  }
 0x49b   : > { %1739 = vmatprep.subr.bf16.mxu0 %v1960_v15 }
 0x4a0   : > { %1730 = vmatmul.mubr.msk.bf16.vlgmr.msra.gmra.mxu0 %vm750_vm3, %v985_v17 }
 0x4a1   : > { %1743 = vmatprep.mubr.msk.bf16.mxu0 %vm1961_vm1, %v1960_v15  ;;  %1740 = vmatpush3.bf16.msra.mxu0 %v1846_v28  ;;  %v1856_v28 = vld [vmem:[%s2366_s11 + $0x8] sm:$0xff]  }
 0x4a2   : > { %1741 = vmatprep.subr.bf16.mxu0 %v1960_v15 }
 0x4a5   : > { %1742 = vmatpush3.bf16.msra.mxu0 %v1847_v41 }
 0x4a6   : > { %1755 = vmatprep.subr.bf16.mxu0 %v1960_v15 }
 0x4bf   : > { %v974_v18 = vpop.xlane.xlu1 %973 }
 0x4c0   : > { %1876 = vrcp.f32 %v974_v18 }
 0x4c3   : > { %v632_v19 = vpop.permute.xlu1 %631 }
 0x4c4   : > { %635 = vst.msk [vmem:[#allocation3 + $0xc] sm:$0xf] %vm597_vm2, %v632_v19 }
 0x4cb   : > { %v745_v20 = vld [vmem:[#allocation3 + $0xc] sm:$0xf] }
 0x4cc   : > { %v1130_v21 = vsel %vm990_vm4, %v745_v20, 0  ;;  %v1850_v20 = vld [vmem:[%s2366_s11 + $0x38] sm:$0xff]  }
 0x4cd   : > { %v1877_v22 = vpop.eup %1876  ;;  %1734 = vmatpush3.bf16.msra.mxu1 %v1130_v21  ;;  %v1852_v21 = vld [vmem:[%s2366_s11 + $0x28] sm:$0xff]  }
 0x4ce   : > { %v982_v23 = vmul.f32 %v1877_v22, %v1869_v58  ;;  %1747 = vmatprep.subr.bf16.mxu1 %v1960_v15  ;;  %v1853_v22 = vld [vmem:[%s2366_s11 + $0x20] sm:$0xff]  }
 0x4d0   : > { %v986_v27 = vpack.c.bf16 %v982_v23, %v982_v23  ;;  %v1854_v23 = vld [vmem:[%s2366_s11 + $0x18] sm:$0xff]  }
 0x4d2   : > { %1736 = vmatmul.mubr.msk.bf16.vlgmr.msra.gmra.mxu1 %vm750_vm3, %v986_v27  ;;  %v1855_v27 = vld [vmem:[%s2366_s11 + $0x10] sm:$0xff]  }
 0x4d3   : > { %1751 = vmatprep.mubr.msk.bf16.mxu1 %vm1961_vm1, %v1960_v15  ;;  %1748 = vmatpush3.bf16.msra.mxu1 %v1848_v6 }
 0x4d4   : > { %1749 = vmatprep.subr.bf16.mxu1 %v1960_v15 }
 0x558   : > { %v1028_v29 = vpop.f32.mrf.mxu0 }
 0x559   : > { %v1074_v30 = vpop.f32.mrf.mxu1 }
 0x55a   : > { %v1719_v31 = vpop.f32.mrf.mxu0  ;;  %1173 = vrot.lane.b32.xlu0 %v1074_v30, %s1969_s16  ;;  %v1620_v30 = vld [vmem:[%s2365_s10] ss:$0 sm:$0xff]  ;;  %s1882_s16 = scalar_lea.vmem %s1496_s14, 128 }
 0x55b   : > { %v1725_v32 = vpop.f32.mrf.mxu1  ;;  %p1883_p12 = scmp.ne.s32.totalorder %s1496_s14, %s1882_s16 }
 0x55c   : > { %v1031_v33 = vpop.f32.mrf.mxu0 }
 0x55d   : > { %v1077_v34 = vpop.f32.mrf.mxu1  ;;  %p1884_p13 = pnand %p1883_p12, %p2083_p4 }
 0x55e   : > { %v1720_v35 = vpop.f32.mrf.mxu0 }
 0x55f   : > { %v1726_v36 = vpop.f32.mrf.mxu1  ;;  %p1885_p0 = pneg %p1884_p13 }
 0x560   : > { %v1120_v37 = vpop.f32.mrf.mxu0 }
 0x561   : > { %1177 = vrot.lane.b32.xlu1 %v1120_v37, %s1970_s22  ;;  %s1634_s22 = sshll.u32 %s1950_s28, 7  ;;  %s1972_s28 = smov [#allocation4]  }
 0x562   : > { %v1731_v38 = vpop.f32.mrf.mxu0  ;;  %s2314_s1 = scalar_lea.hbm %s2368_s13, %s1634_s22  ;;  %s1886_s17 = sshll.u32 %s1972_s28, 4  ;;  %s1887_s17 = int_to_ptr.vmem [resolvable:$false] %s1886_s17 }
 0x563   : > { %s1888_s2 = scalar_lea.vmem %s1887_s17, 256  ;;  %p1889_p1 = scmp.lt.s32.totalorder %s1496_s14, %s1887_s17 }
 0x564   : > { %v1123_v39 = vpop.f32.mrf.mxu0  ;;  %p1890_p2 = scmp.lt.s32.totalorder %s1888_s2, %s1882_s16 }
 0x566   : > { %v1732_v40 = vpop.f32.mrf.mxu0  ;;  %p1891_p3 = por %p1890_p2, %p1889_p1 }
 0x568   : > { %p1892_p5 = pnand %p1891_p3, %p1885_p0 }
 0x592   : > { %v1166_v42 = vpop.f32.mrf.mxu1 }
 0x593   : > { %1181 = vrot.lane.b32.xlu0 %v1166_v42, %s1971_s15 }
 0x594   : > { %v1737_v43 = vpop.f32.mrf.mxu1 }
 0x596   : > { %v1169_v44 = vpop.f32.mrf.mxu1 }
 0x598   : > { %v1738_v45 = vpop.f32.mrf.mxu1 }
 0x599   : > { %v1475_v45 = vsub.s32 5, %v2136_v24 }
 0x5cc   : > { %v1174_v46 = vpop.permute.xlu0 %1173 }
 0x5cd   : > { %v1184_v49 = vsel %vm750_vm3, %v1028_v29, %v1174_v46  ;;  %v1857_v29 = vld [vmem:[%s2366_s11] sm:$0xff]  }
 0x5ce   : > { %v1624_v46 = vld [vmem:[%s2367_s12] ss:$0 sm:$0xff] }
 0x5d3   : > { %v1178_v48 = vpop.permute.xlu1 %1177 }
 0x5d4   : > { %v1186_v50 = vsel %vm1185_vm5, %v1184_v49, %v1178_v48  ;;  %v1476_v48 = vrot.slane %v2138_v25, %v1475_v45 }
 0x605   : > { %v1182_v51 = vpop.permute.xlu0 %1181 }
 0x606   : > { %v1188_v52 = vsel %vm1187_vm6, %v1186_v50, %v1182_v51 }
 0x607   : > { %v1189_v53 = vpack.c.bf16 %v1188_v52, %v1188_v52 }
 0x609   : > { %1744 = vmatmul.mubr.msk.bf16.vlgmr.msra.gmra.mxu0 %vm504_vm0, %v1189_v53 }
 0x60a   : > { %1771 = vmatprep.mubr.msk.bf16.mxu0 %vm1961_vm1, %v1960_v15  ;;  %1756 = vmatpush3.bf16.msra.mxu0 %v1850_v20 }
 0x60b   : > { %1757 = vmatprep.subr.bf16.mxu0 %v1960_v15 }
 0x60e   : > { %1758 = vmatpush3.bf16.msra.mxu0 %v1851_v26 }
 0x60f   : > { %1759 = vmatprep.subr.bf16.mxu0 %v1960_v15 }
 0x612   : > { %1760 = vmatpush3.bf16.msra.mxu0 %v1852_v21 }
 0x613   : > { %1761 = vmatprep.subr.bf16.mxu0 %v1960_v15 }
 0x616   : > { %1762 = vmatpush3.bf16.msra.mxu0 %v1853_v22 }
 0x617   : > { %1763 = vmatprep.subr.bf16.mxu0 %v1960_v15 }
 0x61a   : > { %1764 = vmatpush3.bf16.msra.mxu0 %v1854_v23 }
 0x61b   : > { %1765 = vmatprep.subr.bf16.mxu0 %v1960_v15 }
 0x61e   : > { %1766 = vmatpush3.bf16.msra.mxu0 %v1855_v27 }
 0x61f   : > { %1767 = vmatprep.subr.bf16.mxu0 %v1960_v15 }
 0x622   : > { %1768 = vmatpush3.bf16.msra.mxu0 %v1856_v28 }
 0x623   : > { %1769 = vmatprep.subr.bf16.mxu0 %v1960_v15 }
 0x626   : > { %1770 = vmatpush3.bf16.msra.mxu0 %v1857_v29 }
 0x6c9   : > { %v1250_v57 = vpop.f32.mrf.mxu0 }
 0x6ca   : > { %v1251_v58 = vadd.f32 %v1616_v55, %v1250_v57 }
 0x6cb   : > { %v1745_v59 = vpop.f32.mrf.mxu0 }
 0x6cc   : > { %v1260_v60 = vmul.f32 %v1259_v56, %v1251_v58 }
 0x6cd   : > { %v1253_v61 = vpop.f32.mrf.mxu0 }
 0x6ce   : > { %v2251_v62 = vadd.f32 %v1260_v60, %v2111_v2  ;;  %v1849_v2 = vld [vmem:[%s2364_s9] sm:$0xff]  }
 0x6cf   : > { %v1746_v63 = vpop.f32.mrf.mxu0  ;;  %1750 = vmatpush3.bf16.msra.mxu1 %v1849_v2 }
 0x6d0   : > { %v1262_v0 = vsel %vm504_vm0, %v2251_v62, 0.0 }
 0x6d1   : > { %1263 = vadd.xlane.f32.xlu1 %v1262_v0 }
 0x75a   : > { %v1264_v1 = vpop.xlane.xlu1 %1263 }
 0x75b   : > { %v1265_v3 = vmul.f32 0.03125, %v1264_v1 }
 0x75d   : > { %v1266_v4 = vsub.f32 %v2251_v62, %v1265_v3 }
 0x75f   : > { %v1267_v5 = vmul.f32 %v1266_v4, %v1266_v4 }
 0x761   : > { %v1268_v47 = vsel %vm504_vm0, %v1267_v5, 0.0 }
 0x762   : > { %1269 = vadd.xlane.f32.xlu0 %v1268_v47 }
 0x7eb   : > { %v1270_v7 = vpop.xlane.xlu0 %1269 }
 0x7ec   : > { %v1271_v8 = vmul.f32 0.03125, %v1270_v7 }
 0x7ee   : > { %v1272_v9 = vadd.f32 1e-06, %v1271_v8 }
 0x7f0   : > { %1878 = vrsqrt.f32 %v1272_v9 }
 0x7fd   : > { %v1879_v13 = vpop.eup %1878 }
 0x7fe   : > { %v1274_v16 = vmul.f32 %v1879_v13, %v1266_v4 }
 0x800   : > { %v1279_v17 = vmul.f32 %v1278_v12, %v1274_v16 }
 0x802   : > { %v1284_v18 = vadd.f32 %v1283_v14, %v1279_v17 }
 0x804   : > { %v1285_v19 = vpack.c.bf16 %v1284_v18, %v1284_v18 }
 0x806   : > { %1752 = vmatmul.mubr.msk.bf16.vlgmr.msra.gmra.mxu1 %vm504_vm0, %v1285_v19 }
 0x8c6   : > { %v1346_v31 = vpop.f32.mrf.mxu1 }
 0x8c7   : > { %v1347_v32 = vadd.f32 %v1620_v30, %v1346_v31 }
 0x8c8   : > { %v1753_v33 = vpop.f32.mrf.mxu1 }
 0x8c9   : > { %v1353_v34 = vmul.f32 0.044715, %v1347_v32  ;;  %v1352_v15 = vmul.f32 0.5, %v1347_v32 }
 0x8ca   : > { %v1349_v35 = vpop.f32.mrf.mxu1 }
 0x8cb   : > { %v1354_v36 = vmul.f32 %v1353_v34, %v1347_v32 }
 0x8cc   : > { %v1754_v37 = vpop.f32.mrf.mxu1 }
 0x8cd   : > { %v1355_v38 = vmul.f32 %v1354_v36, %v1347_v32 }
 0x8cf   : > { %v1356_v39 = vadd.f32 %v1355_v38, %v1347_v32 }
 0x8d1   : > { %v1357_v40 = vmul.f32 0.7978846, %v1356_v39 }
 0x8d3   : > { %1880 = vtanh.f32 %v1357_v40 }
 0x8e0   : > { %v1881_v41 = vpop.eup %1880 }
 0x8e1   : > { %v1359_v42 = vadd.f32 1.0, %v1881_v41 }
 0x8e3   : > { %v1360_v43 = vmul.f32 %v1359_v42, %v1352_v15 }
 0x8e5   : > { %v1361_v44 = vpack.c.bf16 %v1360_v43, %v1360_v43 }
 0x8e7   : > { %1772 = vmatmul.mubr.bf16.vlgmr.msra.gmra.mxu0 %v1361_v44 }
 0x9a7   : > { %v1467_v49 = vpop.f32.mrf.mxu0 }
 0x9a8   : > { %v1468_v50 = vadd.f32 %v1624_v46, %v1467_v49 }
 0x9a9   : > { %v1773_v51 = vpop.f32.mrf.mxu0 }
 0x9aa   : > { %v1477_v52 = vmul.f32 %v1476_v48, %v1468_v50 }
 0x9ab   : > { %v1470_v53 = vpop.f32.mrf.mxu0 }
 0x9ac   : > { %v1478_v54 = vadd.f32 %v1477_v52, %v2251_v62 }
 0x9ad   : > { %v1774_v24 = vpop.f32.mrf.mxu0 }
 0x9ae   : > { %1479 = vst.msk [vmem:[%s479_s24] sm:$0xff] %vm504_vm0, %v1478_v54 }
 0x9af   : > { %1895 = shalt.err (!%p1892_p5)
}
 0x9b0   : > { %s1896_s0 = scalar_lea.hbm %s2314_s1, 128  ;;  %s1900_s24 = scalar_lea.hbm %s2368_s13, 256 }
 0x9b1   : > { %p1897_p6 = scmp.ne.s32.totalorder %s2314_s1, %s1896_s0  ;;  %p1901_p10 = scmp.lt.s32.totalorder %s2314_s1, %s2368_s13 }
 0x9b2   : > { %p1902_p11 = scmp.lt.s32.totalorder %s1900_s24, %s1896_s0 }
 0x9b3   : > { %p1898_p7 = pnand %p1897_p6, %p2083_p4 }
 0x9b4   : > { %p1903_p12 = por %p1902_p11, %p1901_p10 }
 0x9b5   : > { %p1899_p9 = pneg %p1898_p7 }
 0x9b7   : > { %p1904_p13 = pnand %p1903_p12, %p1899_p9 }
 0x9b9   : > { %1907 = shalt.err (!%p1904_p13)
}
 0x9ba   : > { %1775 = dma.vmem_to_hbm [thread:$0]  (%p2083_p4), %s1496_s14, 128, %s2314_s1, %s1481_s23  }
 0x9bb PF: > { %p1781_p0 = scmp.ge.s32.totalorder %s1958_s30, 2  ;;  %s1507_s2 = sand.u32 1, %s1938_s25  }
 0x9bc   : > { %s1508_s16 = scalar_lea.sflag [#allocation5], %s1507_s2 }
 0x9bd   : > { %p1778_p1 = pnand %p1781_p0, %p2090_p8 }
 0x9bf   : > { %p1779_p2 = pneg %p1778_p1 }
 0x9c1   : > { %1933 = dma.done.wait (%p1779_p2), %s1508_s16, 128  }
 0x9c2   : > { %1935 = vsyncadd (%p1779_p2), %s1508_s16, 4294967168  ;;  %s26_s30 = sadd.s32 1, %s1958_s30   ;;  %s2379_s1 = sld [smem:[#allocation7_spill]] }
 0x9c3   : > { %p23_p3 = scmp.ge.s32.totalorder %s26_s30, 4   ;;  %s2380_s25 = smov %s1942_s26 }
 0x9c4   : > { %s2381_s26 = smov %s1946_s27  ;;  %s2382_s27 = smov %s2096_s21 }
 0x9c5   : > { %s2383_s28 = smov %s1954_s29  ;;  %25 = sbr.rel (!%p23_p3) target bundleno = 8 (0x8), region = 123 }
 0x9c8   : > { %s2384_s29 = smov %s2379_s1 }
 0x9ca   :  { %1513 = vsyncpa [#allocation5], 1 }
 0x9cb   :  { %1515 = vsyncpa [#allocation5 + $0x1], 1 }

</bundles_post_ra>
